<compile_context>
chip_gen: v6e
topology: v6e:2x2x1
jax: 0.10.0
libtpu: 0.0.40
codegen_flags: <defaults>
</compile_context>

<pallas_src>
import jax
import jax.numpy as jnp
from jax.experimental import pallas as pl
from jax.experimental.pallas import tpu as pltpu


def _round_up(a, b):
    return (a + b - 1) // b * b


def _choose_tile_m(m, tile_m_max):
    """Rows of patches per grid step.

    Rules: multiple of 16 (bf16 (16,128) sublane packing); at most tile_m_max
    (rounded up to 16); for large M force >= 2 grid steps so both v7x
    TensorCores get work; otherwise as large as possible so the ~0.35us
    per-step overhead is amortized.
    """
    tile_m_max = max(16, _round_up(int(tile_m_max), 16))
    if m <= tile_m_max:
        if m <= 1024:                      # tiny problem: one step is cheapest
            return _round_up(m, 16)
        return _round_up(pl.cdiv(m, 2), 16)  # >=2 steps for megacore sharding
    n_tiles = max(2, pl.cdiv(m, tile_m_max))
    return _round_up(pl.cdiv(m, n_tiles), 16)


def _patch_proj_kernel(patches_ref, w_ref, b_ref, out_ref):
    # patches_ref: (tm, K) bf16, w_ref: (K, N) bf16, b_ref: (1, N) f32,
    # out_ref: (tm, N) out_dtype.  f32 accumulate on the MXU, bias on the VPU.
    acc = jnp.dot(patches_ref[...], w_ref[...],
                  preferred_element_type=jnp.float32)
    out_ref[...] = (acc + b_ref[...]).astype(out_ref.dtype)


def patch_embed_forward(x, weight, bias, patch_size=(4, 4), *, tile_m=8192,
                        out_dtype=jnp.bfloat16):
    """Forward pass of PatchEmbed.

    Args:
      x:      (B, C, H, W) float32 -- NCHW, as in PyTorch.
      weight: (embed_dim, C, ph, pw) float32 -- PyTorch Conv2d weight layout.
      bias:   (embed_dim,) float32.
      patch_size: (ph, pw).
      tile_m: upper bound on patch rows per grid step (auto-tuned below it).
      out_dtype: output dtype (default bf16; use jnp.float32 for f32 parity).

    Returns:
      (B, Hp, Wp, embed_dim) out_dtype, Hp = ceil(H/ph), Wp = ceil(W/pw).
    """
    ph, pw = patch_size
    B, C, H, W = x.shape
    embed_dim = weight.shape[0]

    # Zero-pad W then H up to multiples of the patch size (like F.pad).
    pad_h = (-H) % ph
    pad_w = (-W) % pw
    if pad_h or pad_w:
        x = jnp.pad(x, ((0, 0), (0, 0), (0, pad_h), (0, pad_w)))
    Hp = (H + pad_h) // ph
    Wp = (W + pad_w) // pw

    # im2col in the wrapper: (B,C,Hp*ph,Wp*pw) -> (B,Hp,Wp,C,ph,pw) -> (M,K),
    # cast to bf16.  Under jit this is one fused XLA transpose/convert copy.
    xp = x.reshape(B, C, Hp, ph, Wp, pw)
    xp = jnp.transpose(xp, (0, 2, 4, 1, 3, 5))
    patches = xp.reshape(B * Hp * Wp, C * ph * pw).astype(jnp.bfloat16)

    # Conv weight (embed_dim, C, ph, pw) -> (K, N); K ordering matches patches.
    w_mat = weight.reshape(embed_dim, C * ph * pw).T.astype(jnp.bfloat16)
    b_mat = bias.reshape(1, embed_dim).astype(jnp.float32)

    M, K = patches.shape
    N = embed_dim

    tm = _choose_tile_m(M, tile_m)
    grid = (pl.cdiv(M, tm),)   # remainder handled by Pallas partial blocks

    cost = pl.CostEstimate(
        flops=2 * M * K * N,
        transcendentals=0,
        bytes_accessed=(M * K * 2) + (K * N * 2) + (N * 4)
        + M * N * jnp.dtype(out_dtype).itemsize,
    )

    out = pl.pallas_call(
        _patch_proj_kernel,
        out_shape=jax.ShapeDtypeStruct((M, N), out_dtype),
        grid_spec=pltpu.PrefetchScalarGridSpec(
            num_scalar_prefetch=0,
            grid=grid,
            in_specs=[
                pl.BlockSpec((tm, K), lambda i: (i, 0)),   # patch tiles stream
                pl.BlockSpec((K, N), lambda i: (0, 0)),    # weight resident
                pl.BlockSpec((1, N), lambda i: (0, 0)),    # bias resident
            ],
            out_specs=pl.BlockSpec((tm, N), lambda i: (i, 0)),
        ),
        compiler_params=pltpu.CompilerParams(
            dimension_semantics=("parallel",),   # v7x: shard tiles across 2 TCs
            vmem_limit_bytes=32 * 1024 * 1024,
        ),
        cost_estimate=cost,
    )(patches, w_mat, b_mat)

    return out.reshape(B, Hp, Wp, embed_dim)


def _reference(x, weight, bias, patch_size=(4, 4)):
    """Pure-JAX f32 reference (conv via lax.conv_general_dilated)."""
    ph, pw = patch_size
    pad_h = (-x.shape[2]) % ph
    pad_w = (-x.shape[3]) % pw
    if pad_h or pad_w:
        x = jnp.pad(x, ((0, 0), (0, 0), (0, pad_h), (0, pad_w)))
    y = jax.lax.conv_general_dilated(
        x, weight, window_strides=(ph, pw), padding="VALID",
        dimension_numbers=("NCHW", "OIHW", "NCHW"),
    )
    y = y + bias[None, :, None, None]
    return jnp.transpose(y, (0, 2, 3, 1))


if __name__ == "__main__":
    # Module defaults: patch_size=4, in_chans=3, embed_dim=96, norm_layer=None.
    # H = W = 18 is deliberately not a multiple of 4 so the F.pad path and the
    # partial-last-tile path are both exercised.
    patch_size = (4, 4)
    in_chans = 3
    embed_dim = 96
    B, H, W = 2, 18, 18

    key = jax.random.PRNGKey(0)
    kx, kw, kb = jax.random.split(key, 3)
    x = jax.random.normal(kx, (B, in_chans, H, W), dtype=jnp.float32)
    weight = jax.random.normal(
        kw, (embed_dim, in_chans, patch_size[0], patch_size[1]),
        dtype=jnp.float32) * 0.02
    bias = jax.random.normal(kb, (embed_dim,), dtype=jnp.float32) * 0.02

    ref = _reference(x, weight, bias, patch_size)

    # 1) Default tiling (single grid step for this tiny M), bf16 output.
    fwd_default = jax.jit(lambda a, w, b: patch_embed_forward(a, w, b, patch_size))
    out1 = jax.block_until_ready(fwd_default(x, weight, bias))

    # 2) Tiny tile -> multi-step grid with a partial final tile; f32 output.
    fwd_small = jax.jit(lambda a, w, b: patch_embed_forward(
        a, w, b, patch_size, tile_m=16, out_dtype=jnp.float32))
    out2 = jax.block_until_ready(fwd_small(x, weight, bias))

    Hp = (H + (-H) % patch_size[0]) // patch_size[0]
    Wp = (W + (-W) % patch_size[1]) // patch_size[1]
    assert out1.shape == (B, Hp, Wp, embed_dim), out1.shape
    assert out2.shape == (B, Hp, Wp, embed_dim), out2.shape
    assert out1.dtype == jnp.bfloat16, out1.dtype
    assert out2.dtype == jnp.float32, out2.dtype

    # bf16 inputs + f32 accumulate -> loosened tolerance vs. the f32 reference.
    for out in (out1, out2):
        o = out.astype(jnp.float32)
        assert jnp.allclose(o, ref, atol=2e-2, rtol=2e-2), float(
            jnp.max(jnp.abs(o - ref)))

    print("KERNEL_OK")
</pallas_src>

<mosaic_0001>
module attributes {stable_mosaic.version = 11 : i64} {
  func.func @_patch_proj_kernel(%arg0: i32, %arg1: memref<64x48xbf16, #tpu.memory_space<vmem>>, %arg2: memref<48x96xbf16, #tpu.memory_space<vmem>>, %arg3: memref<1x96xf32, #tpu.memory_space<vmem>>, %arg4: memref<64x96xbf16, #tpu.memory_space<vmem>>) attributes {dimension_semantics = [#tpu.dimension_semantics<parallel>], iteration_bounds = array<i64: 1>, scalar_prefetch = 0 : i64, scratch_operands = 0 : i64, tpu.core_type = #tpu.core_type<tc>, window_params = [{transform_indices = @transform_0, window_bounds = array<i64: 64, 48>}, {pipeline_mode = #tpu.pipeline_mode<synchronous>, transform_indices = @transform_1, window_bounds = array<i64: 48, 96>}, {pipeline_mode = #tpu.pipeline_mode<synchronous>, transform_indices = @transform_2, window_bounds = array<i64: 1, 96>}, {transform_indices = @transform_3, window_bounds = array<i64: 64, 96>}]} {
    %c0 = arith.constant 0 : index
    %c0_0 = arith.constant 0 : index
    %0 = vector.load %arg1[%c0, %c0_0] : memref<64x48xbf16, #tpu.memory_space<vmem>>, vector<64x48xbf16>
    %c0_1 = arith.constant 0 : index
    %c0_2 = arith.constant 0 : index
    %1 = vector.load %arg2[%c0_1, %c0_2] : memref<48x96xbf16, #tpu.memory_space<vmem>>, vector<48x96xbf16>
    %cst = arith.constant dense<0.000000e+00> : vector<64x96xf32>
    %2 = tpu.matmul %0, %1, %cst {dimension_numbers = #tpu.dot_dimension_numbers<[1], [0], [0], [1], [0, 0, 1, 1], [], []>} : vector<64x48xbf16>, vector<48x96xbf16>, vector<64x96xf32> -> vector<64x96xf32>
    %c0_3 = arith.constant 0 : index
    %c0_4 = arith.constant 0 : index
    %3 = vector.load %arg3[%c0_3, %c0_4] : memref<1x96xf32, #tpu.memory_space<vmem>>, vector<1x96xf32>
    %4 = vector.broadcast %3 : vector<1x96xf32> to vector<64x96xf32>
    %5 = arith.addf %2, %4 : vector<64x96xf32>
    %6 = arith.truncf %5 : vector<64x96xf32> to vector<64x96xbf16>
    %c0_5 = arith.constant 0 : index
    %c0_6 = arith.constant 0 : index
    %7 = vector.load %arg4[%c0_5, %c0_6] : memref<64x96xbf16, #tpu.memory_space<vmem>>, vector<64x96xbf16>
    tpu.vector_store %arg4[%c0_5, %c0_6], %6 {strides = array<i32>} : memref<64x96xbf16, #tpu.memory_space<vmem>>, vector<64x96xbf16>,
    return
  }
  func.func @transform_0(%arg0: i32) -> (i32, i32) {
    %c0_i32 = arith.constant 0 : i32
    %c0_i32_0 = arith.constant 0 : i32
    return %arg0, %c0_i32 : i32, i32
  }
  func.func @transform_1(%arg0: i32) -> (i32, i32) {
    %c0_i32 = arith.constant 0 : i32
    %c0_i32_0 = arith.constant 0 : i32
    %c0_i32_1 = arith.constant 0 : i32
    return %c0_i32, %c0_i32_0 : i32, i32
  }
  func.func @transform_2(%arg0: i32) -> (i32, i32) {
    %c0_i32 = arith.constant 0 : i32
    %c0_i32_0 = arith.constant 0 : i32
    %c0_i32_1 = arith.constant 0 : i32
    return %c0_i32, %c0_i32_0 : i32, i32
  }
  func.func @transform_3(%arg0: i32) -> (i32, i32) {
    %c0_i32 = arith.constant 0 : i32
    %c0_i32_0 = arith.constant 0 : i32
    return %arg0, %c0_i32 : i32, i32
  }
}

</mosaic_0001>

<bundles_post_ra>
// kernel: _lambda_.1
= control target key start
LH: loop header
LB: loop body
LE: loop exit
PB: predicated region body
PF: predicated region fallthrough
CT: control target
= control target key end

     0   :  { %vm74_vm0 = vcmask 392192   ;;  %vm184_vm1 = vcmask 781312   ;;  %s404_s0 = inlined_call_operand.vmem [shape: bf16[50,48], index: 0, kind: input, shape index: {}]   ;;  %s405_s1 = inlined_call_operand.vmem [shape: bf16[48,96], index: 1, kind: input, shape index: {}]   ;;  %s406_s2 = inlined_call_operand.vmem [shape: f32[1,96], index: 2, kind: input, shape index: {}]   ;;  %s407_s3 = inlined_call_operand.vmem [shape: bf16[50,96], index: 3, kind: output, shape index: {}]  }
   0x1   :  { %v321_v0 = vld [vmem:[%s405_s1 + $0x10] sm:$0xff]   ;;  %v322_v1 = vld [vmem:[%s405_s1 + $0x8] sm:$0xff]   ;;  %v323_v2 = vld [vmem:[%s405_s1] sm:$0xff]  }
   0x2   :  { %301 = vmatprep.subr.bf16.mxu0 %v321_v0  ;;  %315 = vmatprep.subr.bf16.mxu1 %v321_v0  ;;  %v324_v3 = vld [vmem:[%s404_s0] sm:$0xff]   ;;  %v325_v4 = vld [vmem:[%s404_s0 + $0x10] sm:$0xff]   ;;  %v326_v5 = vld [vmem:[%s404_s0 + $0x8] sm:$0xff]  }
   0x3   :  { %302 = vmatpush3.bf16.msra.mxu0 %v321_v0  ;;  %318 = vmatpush3.bf16.msra.mxu1 %v321_v0  ;;  %v327_v6 = vld [vmem:[%s404_s0 + $0x18] sm:$0xff]   ;;  %v266_v7 = vld [vmem:[%s406_s2] ss:$0 sm:$0xff] }
   0x4   :  { %303 = vmatprep.subr.bf16.mxu0 %v322_v1  ;;  %316 = vmatprep.subr.bf16.mxu1 %v322_v1 }
   0x5   :  { %307 = vmatprep.mubr.msk.bf16.mxu0 %vm74_vm0, %v324_v3  ;;  %311 = vmatprep.mubr.msk.bf16.mxu1 %vm74_vm0, %v325_v4 }
   0x7   :  { %304 = vmatpush3.bf16.msra.mxu0 %v322_v1  ;;  %319 = vmatpush3.bf16.msra.mxu1 %v322_v1 }
   0x8   :  { %305 = vmatprep.subr.bf16.mxu0 %v323_v2  ;;  %317 = vmatprep.subr.bf16.mxu1 %v323_v2 }
   0xb   :  { %306 = vmatpush3.bf16.msra.mxu0 %v323_v2  ;;  %320 = vmatpush3.bf16.msra.mxu1 %v323_v2 }
   0xe   :  { %308 = vmatmul.mubr.msk.bf16.vlgmr.msra.gmra.mxu0 %vm74_vm0, %v326_v5  ;;  %312 = vmatmul.mubr.msk.bf16.vlgmr.msra.gmra.mxu1 %vm74_vm0, %v327_v6 }
  0xce   :  { %v309_v8 = vpop.f32.mrf.mxu0  ;;  %v313_v9 = vpop.f32.mrf.mxu1 }
  0xcf   :  { %v130_v10 = vadd.f32 %v309_v8, %v266_v7  ;;  %v146_v11 = vadd.f32 %v313_v9, %v266_v7 }
  0xd0   :  { %v121_v12 = vpop.f32.mrf.mxu0  ;;  %v137_v13 = vpop.f32.mrf.mxu1 }
  0xd1   :  { %v288_v14 = vpack.c.bf16 %v130_v10, %v130_v10  ;;  %v292_v15 = vpack.c.bf16 %v146_v11, %v146_v11  ;;  %v122_v16 = vadd.f32 %v266_v7, %v121_v12  ;;  %v138_v17 = vadd.f32 %v266_v7, %v137_v13 }
  0xd2   :  { %v310_v18 = vpop.f32.mrf.mxu0  ;;  %v314_v19 = vpop.f32.mrf.mxu1 }
  0xd3   :  { %187 = vst.msk [vmem:[#allocation2 + $0x8] sm:$0xf] %vm184_vm1, %v288_v14  ;;  %191 = vst.msk [vmem:[#allocation2 + $0x18] sm:$0xf] %vm184_vm1, %v292_v15  ;;  %v286_v20 = vpack.c.bf16 %v122_v16, %v122_v16  ;;  %v290_v21 = vpack.c.bf16 %v138_v17, %v138_v17  ;;  %v133_v22 = vadd.f32 %v310_v18, %v266_v7 }
  0xd4   :  { %v124_v23 = vpop.f32.mrf.mxu0  ;;  %v140_v24 = vpop.f32.mrf.mxu1 }
  0xd5   :  { %185 = vst.msk [vmem:[#allocation2] sm:$0xf] %vm184_vm1, %v286_v20  ;;  %189 = vst.msk [vmem:[#allocation2 + $0x10] sm:$0xf] %vm184_vm1, %v290_v21  ;;  %v289_v25 = vpack.c.bf16 %v133_v22, %v133_v22  ;;  %v125_v26 = vadd.f32 %v266_v7, %v124_v23  ;;  %v141_v27 = vadd.f32 %v266_v7, %v140_v24 }
  0xd7   :  { %188 = vst.msk [vmem:[#allocation2 + $0xc] sm:$0xf] %vm184_vm1, %v289_v25  ;;  %v287_v28 = vpack.c.bf16 %v125_v26, %v125_v26  ;;  %v291_v29 = vpack.c.bf16 %v141_v27, %v141_v27 }
  0xd9   :  { %186 = vst.msk [vmem:[#allocation2 + $0x4] sm:$0xf] %vm184_vm1, %v287_v28  ;;  %190 = vst.msk [vmem:[#allocation2 + $0x14] sm:$0xf] %vm184_vm1, %v291_v29 }
  0xda   :  { %v215_v30 = vld [vmem:[#allocation2 + $0x8] sm:$0xf]  ;;  %v223_v31 = vld [vmem:[#allocation2 + $0x18] sm:$0xf] }
  0xdb   :  { %216 = vst [vmem:[%s407_s3 + $0x8] sm:$0xf] %v215_v30  ;;  %224 = vst [vmem:[%s407_s3 + $0x18] sm:$0xf] %v223_v31 }
  0xdc   :  { %v211_v32 = vld [vmem:[#allocation2] sm:$0xf]  ;;  %v219_v33 = vld [vmem:[#allocation2 + $0x10] sm:$0xf] }
  0xdd   :  { %212 = vst [vmem:[%s407_s3] sm:$0xf] %v211_v32  ;;  %220 = vst [vmem:[%s407_s3 + $0x10] sm:$0xf] %v219_v33 }
  0xde   :  { %v217_v34 = vld [vmem:[#allocation2 + $0xc] sm:$0xf] }
  0xdf   :  { %218 = vst [vmem:[%s407_s3 + $0xc] sm:$0xf] %v217_v34 }
  0xe0   :  { %v213_v35 = vld [vmem:[#allocation2 + $0x4] sm:$0xf]  ;;  %v221_v36 = vld [vmem:[#allocation2 + $0x14] sm:$0xf] }
  0xe1   :  { %214 = vst [vmem:[%s407_s3 + $0x4] sm:$0xf] %v213_v35  ;;  %222 = vst [vmem:[%s407_s3 + $0x14] sm:$0xf] %v221_v36 }

</bundles_post_ra>
